<compile_context>
chip_gen: v5e
topology: v5e:2x2
jax: 0.10.0
libtpu: 0.0.40
codegen_flags: <defaults>
</compile_context>

<pallas_src>
import functools

import jax
import jax.numpy as jnp
from jax.experimental import pallas as pl
from jax.experimental.pallas import tpu as pltpu


def _gru2d_kernel(h_ref, x_ref, ah_ref, ax_ref, b_ref, wnh_ref, o_ref, *,
                  gate_width, matmul_dtype):
    """One super-row tile of the GRU update.

    h_ref:   (t, GW)    packed hidden features (GW = P*H lanes)
    x_ref:   (t, GX)    packed input features  (GX = P*I lanes)
    ah_ref:  (GW, 2GW)  block-diagonal h-side weights for [r | z]
    ax_ref:  (GX, 3GW)  block-diagonal x-side weights for [r | z | n]
    b_ref:   (1, 3GW)   fused bias [b_r | b_z | b_n] (tiled P times per gate)
    wnh_ref: (GW, GW)   block-diagonal h-side weights of n (applied to r*h)
    o_ref:   (t, GW)
    """
    GW = gate_width
    h = h_ref[...]
    x = x_ref[...]

    hm = h.astype(matmul_dtype)
    xm = x.astype(matmul_dtype)

    # Two MXU passes (f32 accumulation): h -> [r|z], x -> [r|z|n_x].
    rz_h = jnp.dot(hm, ah_ref[...], preferred_element_type=jnp.float32)
    rzn_x = jnp.dot(xm, ax_ref[...], preferred_element_type=jnp.float32)
    pre = rzn_x + b_ref[...]

    # All slices are 128-lane-aligned slabs when GW is a multiple of 128.
    r = jax.nn.sigmoid(pre[:, :GW] + rz_h[:, :GW])
    z = jax.nn.sigmoid(pre[:, GW:2 * GW] + rz_h[:, GW:])
    n_x = pre[:, 2 * GW:]

    # q = tanh((r*h) @ Wn_h + x @ Wn_x + b_n); the x-part is already in n_x.
    q = jnp.tanh(
        jnp.dot((r * h).astype(matmul_dtype), wnh_ref[...],
                preferred_element_type=jnp.float32) + n_x)

    # output = (1 - z) * h + z * q   (elementwise stays f32)
    o_ref[...] = ((1.0 - z) * h + z * q).astype(o_ref.dtype)


def _choose_pack(H, I):
    """Pack factor P: P rows -> one (ideally 128-lane) super-row."""
    if H > 128 or 128 % H != 0:
        return 1
    P = 128 // H
    while P > 1 and P * I > 512:   # keep the block-diagonal x-weights modest
        P //= 2
    return P


def _choose_tile(n_rows, requested):
    """Tile over super-rows: big for throughput; >=4 steps for v7x megacore."""
    if requested >= n_rows or n_rows <= 64:
        return n_rows                      # single block == full dim (legal)
    t = max(8, (min(requested, n_rows) // 8) * 8)
    # Grid is sharded across 2 TCs on v7x; keep >=4 steps so each core still
    # gets >=2 pipelined steps (prefetch overlap), but never shrink below 64.
    while t > 64 and -(-n_rows // t) < 4:
        t = max(64, ((t // 2) // 8) * 8)
    return t


def _build_packed_weights(params, H, I, P, matmul_dtype):
    """Build block-diagonal packed weights from PyTorch Linear params.

    nn.Linear: y = cat(h, x) @ W^T + b, W of shape (H, H+I).
    """
    wr = params["w_r"].T.astype(jnp.float32)   # (H+I, H)
    wz = params["w_z"].T.astype(jnp.float32)
    wn = params["w_n"].T.astype(jnp.float32)
    eye = jnp.eye(P, dtype=jnp.float32)

    def bd(w):                                  # (in, out) -> (P*in, P*out)
        return jnp.kron(eye, w)

    a_h = jnp.concatenate([bd(wr[:H]), bd(wz[:H])], axis=1)              # (P*H, 2*P*H)
    a_x = jnp.concatenate([bd(wr[H:]), bd(wz[H:]), bd(wn[H:])], axis=1)  # (P*I, 3*P*H)
    w_nh = bd(wn[:H])                                                    # (P*H, P*H)
    b4 = jnp.concatenate([jnp.tile(params["b_r"], P),
                          jnp.tile(params["b_z"], P),
                          jnp.tile(params["b_n"], P)]).reshape(1, 3 * P * H)
    return (a_h.astype(matmul_dtype), a_x.astype(matmul_dtype),
            b4.astype(jnp.float32), w_nh.astype(matmul_dtype))


def gru2d_naive_pallas(input_feat, hidden_feat, params, *, tile_rows=4096,
                       matmul_dtype=jnp.float32):
    """Pallas implementation of GRU2D_naive.forward.

    input_feat:  [..., I] float32
    hidden_feat: [..., H] float32 or None (-> zeros_like(input_feat), which --
                 exactly as in the PyTorch module -- assumes I == H)
    params: 'w_r','w_z','w_n' of shape (H, H+I); 'b_r','b_z','b_n' of shape (H,)
    matmul_dtype: jnp.float32 (exact) or jnp.bfloat16 (faster MXU on v6e/v7x,
                  f32 accumulation / f32 elementwise).
    """
    if hidden_feat is None:
        hidden_feat = jnp.zeros_like(input_feat)

    orig_shape = input_feat.shape
    I = orig_shape[-1]
    H = hidden_feat.shape[-1]

    x = input_feat.reshape(-1, I)
    h = hidden_feat.reshape(-1, H)
    N = x.shape[0]

    # ---- lane-dense xP packing (layout plumbing, no compute hoisted) --------
    P = _choose_pack(H, I)
    pad = (-N) % P
    if pad:  # only when N % P != 0, and only <P rows -- not tile-sized padding
        x = jnp.pad(x, ((0, pad), (0, 0)))
        h = jnp.pad(h, ((0, pad), (0, 0)))
    n_rows = N + pad
    n_super = n_rows // P
    GW = P * H
    GX = P * I
    h4 = h.reshape(n_super, GW)
    x4 = x.reshape(n_super, GX)

    a_h, a_x, b4, w_nh = _build_packed_weights(params, H, I, P, matmul_dtype)

    t = _choose_tile(n_super, max(8, (tile_rows // P // 8) * 8))
    grid = (-(-n_super // t),)   # cdiv; ragged last block handled by Pallas

    itemsize = jnp.dtype(matmul_dtype).itemsize
    cost = pl.CostEstimate(
        flops=2 * n_super * (GW * 2 * GW + GX * 3 * GW + GW * GW),
        transcendentals=3 * n_super * GW,
        bytes_accessed=(n_super * (GW + GX + GW) * 4
                        + (GW * 2 * GW + GX * 3 * GW + GW * GW) * itemsize
                        + 3 * GW * 4),
    )

    out = pl.pallas_call(
        functools.partial(_gru2d_kernel, gate_width=GW,
                          matmul_dtype=matmul_dtype),
        out_shape=jax.ShapeDtypeStruct((n_super, GW), input_feat.dtype),
        grid=grid,
        in_specs=[
            pl.BlockSpec((t, GW), lambda i: (i, 0)),        # packed hidden
            pl.BlockSpec((t, GX), lambda i: (i, 0)),        # packed input
            pl.BlockSpec((GW, 2 * GW), lambda i: (0, 0)),   # a_h (resident)
            pl.BlockSpec((GX, 3 * GW), lambda i: (0, 0)),   # a_x (resident)
            pl.BlockSpec((1, 3 * GW), lambda i: (0, 0)),    # bias (resident)
            pl.BlockSpec((GW, GW), lambda i: (0, 0)),       # w_nh (resident)
        ],
        out_specs=pl.BlockSpec((t, GW), lambda i: (i, 0)),
        compiler_params=pltpu.CompilerParams(
            dimension_semantics=("parallel",)),
        cost_estimate=cost,
    )(h4, x4, a_h, a_x, b4, w_nh)

    out = out.reshape(n_rows, H)[:N]
    return out.reshape(orig_shape[:-1] + (H,))


def gru2d_naive_ref(input_feat, hidden_feat, params):
    """Pure-JAX reference matching the PyTorch forward exactly."""
    if hidden_feat is None:
        hidden_feat = jnp.zeros_like(input_feat)
    cat = jnp.concatenate([hidden_feat, input_feat], axis=-1)
    r = jax.nn.sigmoid(cat @ params["w_r"].T + params["b_r"])
    z = jax.nn.sigmoid(cat @ params["w_z"].T + params["b_z"])
    cat2 = jnp.concatenate([r * hidden_feat, input_feat], axis=-1)
    q = jnp.tanh(cat2 @ params["w_n"].T + params["b_n"])
    return (1.0 - z) * hidden_feat + z * q


def init_params(key, input_channel, hidden_channel):
    """Deterministic synthetic parameters (PyTorch Linear layout: (out, in))."""
    ks = jax.random.split(key, 6)
    fan_in = hidden_channel + input_channel
    bound = 1.0 / jnp.sqrt(fan_in)
    shape_w = (hidden_channel, fan_in)
    shape_b = (hidden_channel,)
    return {
        "w_r": jax.random.uniform(ks[0], shape_w, jnp.float32, -bound, bound),
        "b_r": jax.random.uniform(ks[1], shape_b, jnp.float32, -bound, bound),
        "w_z": jax.random.uniform(ks[2], shape_w, jnp.float32, -bound, bound),
        "b_z": jax.random.uniform(ks[3], shape_b, jnp.float32, -bound, bound),
        "w_n": jax.random.uniform(ks[4], shape_w, jnp.float32, -bound, bound),
        "b_n": jax.random.uniform(ks[5], shape_b, jnp.float32, -bound, bound),
    }


if __name__ == "__main__":
    key = jax.random.PRNGKey(0)
    k_in, k_hid, k_param = jax.random.split(key, 3)

    # Small shapes: N points (surfels), feature dims I == H == 32 -> pack P=4.
    N, INPUT_DIM, HIDDEN_DIM = 256, 32, 32
    input_feat = jax.random.normal(k_in, (N, INPUT_DIM), jnp.float32)
    hidden_feat = jax.random.normal(k_hid, (N, HIDDEN_DIM), jnp.float32)
    params = init_params(k_param, INPUT_DIM, HIDDEN_DIM)

    # Unused auxiliary args from the PyTorch signature (not used in forward):
    input_weights_emb = hidden_weights_emb = None
    input_dirs = hidden_dirs = None

    out = jax.block_until_ready(
        gru2d_naive_pallas(input_feat, hidden_feat, params))
    ref = gru2d_naive_ref(input_feat, hidden_feat, params)
    assert out.shape == (N, HIDDEN_DIM)
    assert jnp.allclose(out, ref, atol=1e-5, rtol=1e-5), (
        float(jnp.max(jnp.abs(out - ref))))

    # hidden_feat=None branch (zeros_like(input), assumes I == H like PyTorch).
    out_none = jax.block_until_ready(
        gru2d_naive_pallas(input_feat, None, params))
    ref_none = gru2d_naive_ref(input_feat, None, params)
    assert jnp.allclose(out_none, ref_none, atol=1e-5, rtol=1e-5)

    # Batched shape whose super-row count (105) is not a multiple of 8
    # (single full-extent block path).
    x2 = jax.random.normal(k_in, (2, 3, 70, INPUT_DIM), jnp.float32)
    h2 = jax.random.normal(k_hid, (2, 3, 70, HIDDEN_DIM), jnp.float32)
    out2 = jax.block_until_ready(gru2d_naive_pallas(x2, h2, params))
    ref2 = gru2d_naive_ref(x2, h2, params)
    assert out2.shape == ref2.shape
    assert jnp.allclose(out2, ref2, atol=1e-5, rtol=1e-5)

    # N not divisible by the pack factor + multi-step ragged grid (masked tail).
    x3 = jax.random.normal(k_in, (1234, INPUT_DIM), jnp.float32)
    h3 = jax.random.normal(k_hid, (1234, HIDDEN_DIM), jnp.float32)
    out3 = jax.block_until_ready(
        gru2d_naive_pallas(x3, h3, params, tile_rows=256))
    ref3 = gru2d_naive_ref(x3, h3, params)
    assert jnp.allclose(out3, ref3, atol=1e-5, rtol=1e-5)

    # bf16-matmul lever (v6e/v7x): f32 accumulation, loose tolerance.
    out_bf = jax.block_until_ready(
        gru2d_naive_pallas(input_feat, hidden_feat, params,
                           matmul_dtype=jnp.bfloat16))
    assert jnp.allclose(out_bf, ref, atol=1.5e-1), (
        float(jnp.max(jnp.abs(out_bf - ref))))

    print("KERNEL_OK")
</pallas_src>

<mosaic_0001>
module attributes {stable_mosaic.version = 11 : i64} {
  func.func @_gru2d_kernel(%arg0: i32, %arg1: memref<64x128xf32, #tpu.memory_space<vmem>>, %arg2: memref<64x128xf32, #tpu.memory_space<vmem>>, %arg3: memref<128x256xf32, #tpu.memory_space<vmem>>, %arg4: memref<128x384xf32, #tpu.memory_space<vmem>>, %arg5: memref<1x384xf32, #tpu.memory_space<vmem>>, %arg6: memref<128x128xf32, #tpu.memory_space<vmem>>, %arg7: memref<64x128xf32, #tpu.memory_space<vmem>>) attributes {dimension_semantics = [#tpu.dimension_semantics<parallel>], iteration_bounds = array<i64: 1>, scalar_prefetch = 0 : i64, scratch_operands = 0 : i64, tpu.core_type = #tpu.core_type<tc>, window_params = [{transform_indices = @transform_0, window_bounds = array<i64: 64, 128>}, {transform_indices = @transform_1, window_bounds = array<i64: 64, 128>}, {pipeline_mode = #tpu.pipeline_mode<synchronous>, transform_indices = @transform_2, window_bounds = array<i64: 128, 256>}, {pipeline_mode = #tpu.pipeline_mode<synchronous>, transform_indices = @transform_3, window_bounds = array<i64: 128, 384>}, {pipeline_mode = #tpu.pipeline_mode<synchronous>, transform_indices = @transform_4, window_bounds = array<i64: 1, 384>}, {pipeline_mode = #tpu.pipeline_mode<synchronous>, transform_indices = @transform_5, window_bounds = array<i64: 128, 128>}, {transform_indices = @transform_6, window_bounds = array<i64: 64, 128>}]} {
    %c0 = arith.constant 0 : index
    %c0_0 = arith.constant 0 : index
    %0 = vector.load %arg1[%c0, %c0_0] : memref<64x128xf32, #tpu.memory_space<vmem>>, vector<64x128xf32>
    %c0_1 = arith.constant 0 : index
    %c0_2 = arith.constant 0 : index
    %1 = vector.load %arg2[%c0_1, %c0_2] : memref<64x128xf32, #tpu.memory_space<vmem>>, vector<64x128xf32>
    %c0_3 = arith.constant 0 : index
    %c0_4 = arith.constant 0 : index
    %2 = vector.load %arg3[%c0_3, %c0_4] : memref<128x256xf32, #tpu.memory_space<vmem>>, vector<128x256xf32>
    %cst = arith.constant dense<0.000000e+00> : vector<64x256xf32>
    %3 = tpu.matmul %0, %2, %cst {dimension_numbers = #tpu.dot_dimension_numbers<[1], [0], [0], [1], [0, 0, 1, 1], [], []>} : vector<64x128xf32>, vector<128x256xf32>, vector<64x256xf32> -> vector<64x256xf32>
    %c0_5 = arith.constant 0 : index
    %c0_6 = arith.constant 0 : index
    %4 = vector.load %arg4[%c0_5, %c0_6] : memref<128x384xf32, #tpu.memory_space<vmem>>, vector<128x384xf32>
    %cst_7 = arith.constant dense<0.000000e+00> : vector<64x384xf32>
    %5 = tpu.matmul %1, %4, %cst_7 {dimension_numbers = #tpu.dot_dimension_numbers<[1], [0], [0], [1], [0, 0, 1, 1], [], []>} : vector<64x128xf32>, vector<128x384xf32>, vector<64x384xf32> -> vector<64x384xf32>
    %c0_8 = arith.constant 0 : index
    %c0_9 = arith.constant 0 : index
    %6 = vector.load %arg5[%c0_8, %c0_9] : memref<1x384xf32, #tpu.memory_space<vmem>>, vector<1x384xf32>
    %7 = vector.broadcast %6 : vector<1x384xf32> to vector<64x384xf32>
    %8 = arith.addf %5, %7 : vector<64x384xf32>
    %9 = vector.extract_strided_slice %8 {offsets = [0, 0], sizes = [64, 128], strides = [1, 1]} : vector<64x384xf32> to vector<64x128xf32>
    %10 = vector.extract_strided_slice %3 {offsets = [0, 0], sizes = [64, 128], strides = [1, 1]} : vector<64x256xf32> to vector<64x128xf32>
    %11 = arith.addf %9, %10 : vector<64x128xf32>
    %12 = arith.negf %11 : vector<64x128xf32>
    %13 = math.exp %12 : vector<64x128xf32>
    %cst_10 = arith.constant 1.000000e+00 : f32
    %14 = vector.broadcast %cst_10 : f32 to vector<64x128xf32>
    %15 = arith.addf %14, %13 : vector<64x128xf32>
    %16 = arith.divf %14, %15 : vector<64x128xf32>
    %17 = vector.extract_strided_slice %8 {offsets = [0, 128], sizes = [64, 128], strides = [1, 1]} : vector<64x384xf32> to vector<64x128xf32>
    %18 = vector.extract_strided_slice %3 {offsets = [0, 128], sizes = [64, 128], strides = [1, 1]} : vector<64x256xf32> to vector<64x128xf32>
    %19 = arith.addf %17, %18 : vector<64x128xf32>
    %20 = arith.negf %19 : vector<64x128xf32>
    %21 = math.exp %20 : vector<64x128xf32>
    %cst_11 = arith.constant 1.000000e+00 : f32
    %22 = vector.broadcast %cst_11 : f32 to vector<64x128xf32>
    %23 = arith.addf %22, %21 : vector<64x128xf32>
    %24 = arith.divf %22, %23 : vector<64x128xf32>
    %25 = vector.extract_strided_slice %8 {offsets = [0, 256], sizes = [64, 128], strides = [1, 1]} : vector<64x384xf32> to vector<64x128xf32>
    %26 = arith.mulf %16, %0 : vector<64x128xf32>
    %c0_12 = arith.constant 0 : index
    %c0_13 = arith.constant 0 : index
    %27 = vector.load %arg6[%c0_12, %c0_13] : memref<128x128xf32, #tpu.memory_space<vmem>>, vector<128x128xf32>
    %cst_14 = arith.constant dense<0.000000e+00> : vector<64x128xf32>
    %28 = tpu.matmul %26, %27, %cst_14 {dimension_numbers = #tpu.dot_dimension_numbers<[1], [0], [0], [1], [0, 0, 1, 1], [], []>} : vector<64x128xf32>, vector<128x128xf32>, vector<64x128xf32> -> vector<64x128xf32>
    %29 = arith.addf %28, %25 : vector<64x128xf32>
    %30 = math.tanh %29 : vector<64x128xf32>
    %cst_15 = arith.constant 1.000000e+00 : f32
    %31 = vector.broadcast %cst_15 : f32 to vector<64x128xf32>
    %32 = arith.subf %31, %24 : vector<64x128xf32>
    %33 = arith.mulf %32, %0 : vector<64x128xf32>
    %34 = arith.mulf %24, %30 : vector<64x128xf32>
    %35 = arith.addf %33, %34 : vector<64x128xf32>
    %c0_16 = arith.constant 0 : index
    %c0_17 = arith.constant 0 : index
    %36 = vector.load %arg7[%c0_16, %c0_17] : memref<64x128xf32, #tpu.memory_space<vmem>>, vector<64x128xf32>
    tpu.vector_store %arg7[%c0_16, %c0_17], %35 {strides = array<i32>} : memref<64x128xf32, #tpu.memory_space<vmem>>, vector<64x128xf32>,
    return
  }
  func.func @transform_0(%arg0: i32) -> (i32, i32) {
    %c0_i32 = arith.constant 0 : i32
    %c0_i32_0 = arith.constant 0 : i32
    return %arg0, %c0_i32 : i32, i32
  }
  func.func @transform_1(%arg0: i32) -> (i32, i32) {
    %c0_i32 = arith.constant 0 : i32
    %c0_i32_0 = arith.constant 0 : i32
    return %arg0, %c0_i32 : i32, i32
  }
  func.func @transform_2(%arg0: i32) -> (i32, i32) {
    %c0_i32 = arith.constant 0 : i32
    %c0_i32_0 = arith.constant 0 : i32
    %c0_i32_1 = arith.constant 0 : i32
    return %c0_i32, %c0_i32_0 : i32, i32
  }
  func.func @transform_3(%arg0: i32) -> (i32, i32) {
    %c0_i32 = arith.constant 0 : i32
    %c0_i32_0 = arith.constant 0 : i32
    %c0_i32_1 = arith.constant 0 : i32
    return %c0_i32, %c0_i32_0 : i32, i32
  }
  func.func @transform_4(%arg0: i32) -> (i32, i32) {
    %c0_i32 = arith.constant 0 : i32
    %c0_i32_0 = arith.constant 0 : i32
    %c0_i32_1 = arith.constant 0 : i32
    return %c0_i32, %c0_i32_0 : i32, i32
  }
  func.func @transform_5(%arg0: i32) -> (i32, i32) {
    %c0_i32 = arith.constant 0 : i32
    %c0_i32_0 = arith.constant 0 : i32
    %c0_i32_1 = arith.constant 0 : i32
    return %c0_i32, %c0_i32_0 : i32, i32
  }
  func.func @transform_6(%arg0: i32) -> (i32, i32) {
    %c0_i32 = arith.constant 0 : i32
    %c0_i32_0 = arith.constant 0 : i32
    return %arg0, %c0_i32 : i32, i32
  }
}

</mosaic_0001>

<bundles_post_ra>
// kernel: tpu_custom_call.1
= control target key start
LH: loop header
LB: loop body
LE: loop exit
PB: predicated region body
PF: predicated region fallthrough
CT: control target
= control target key end

     0   :  { %11 = vsyncpa [#allocation3], 0  ;;  %s1524_s0 = inlined_call_operand.hbm [shape: f32[64,128], index: 0, kind: input, shape index: {}]   ;;  %s1525_s1 = inlined_call_operand.hbm [shape: f32[64,128], index: 1, kind: input, shape index: {}]   ;;  %s1526_s2 = inlined_call_operand.hbm [shape: f32[128,256], index: 2, kind: input, shape index: {}]   ;;  %s1527_s3 = inlined_call_operand.hbm [shape: f32[128,384], index: 3, kind: input, shape index: {}]   ;;  %s1528_s4 = inlined_call_operand.vmem [shape: f32[1,384], index: 4, kind: input, shape index: {}]   ;;  %s1529_s5 = inlined_call_operand.hbm [shape: f32[128,128], index: 5, kind: input, shape index: {}]   ;;  %s1530_s6 = inlined_call_operand.hbm [shape: f32[64,128], index: 6, kind: output, shape index: {}]  }
   0x1   :  { %12 = vsyncpa [#allocation6], 0 }
   0x2   :  { %13 = vsyncpa [#allocation9], 0 }
   0x3   :  { %14 = vsyncpa [#allocation4], 0  ;;  %s32_s23 = sshll.u32 %s1525_s1, 4  ;;  %s1165_s24 = smov [#allocation5]   ;;  %s33_s23 = int_to_ptr.hbm [resolvable:$true] %s32_s23 }
   0x4   :  { %s34_s25 = sshll.u32 %s1165_s24, 4  ;;  %s58_s28 = sshll.u32 %s1527_s3, 4  ;;  %s35_s25 = int_to_ptr.vmem [resolvable:$true] %s34_s25  ;;  %s59_s28 = int_to_ptr.hbm [resolvable:$true] %s58_s28 }
   0x5   :  { %s1166_s29 = smov 128   ;;  %s1167_s30 = smov 8  }
   0x6   :  { %40 = dma.hbm_to_vmem [thread:$0]  %s33_s23, 1024, %s35_s25, [#allocation6], %s1166_s29, %s1166_s29, %s1167_s30  }
   0x7   :  { %s1168_s7 = smov [#allocation8]   ;;  %s1169_s9 = smov 384  }
   0x8   :  { %s60_s8 = sshll.u32 %s1168_s7, 4  ;;  %s1170_s1 = smov 24   ;;  %s61_s8 = int_to_ptr.vmem [resolvable:$true] %s60_s8 }
   0x9   :  { %66 = dma.hbm_to_vmem [thread:$0]  %s59_s28, 6144, %s61_s8, [#allocation9], %s1169_s9, %s1169_s9, %s1170_s1  }
   0xa   :  { %s19_s12 = sshll.u32 %s1524_s0, 4  ;;  %s1171_s13 = smov [#allocation2]   ;;  %s20_s12 = int_to_ptr.hbm [resolvable:$true] %s19_s12 }
   0xb   :  { %s21_s3 = sshll.u32 %s1171_s13, 4  ;;  %s45_s16 = sshll.u32 %s1526_s2, 4  ;;  %s22_s3 = int_to_ptr.vmem [resolvable:$true] %s21_s3  ;;  %s46_s16 = int_to_ptr.hbm [resolvable:$true] %s45_s16 }
   0xc   :  { %27 = dma.hbm_to_vmem [thread:$0]  %s20_s12, 1024, %s22_s3, [#allocation3], %s1166_s29, %s1166_s29, %s1167_s30  }
   0xd   :  { %s1172_s17 = smov [#allocation7]   ;;  %s1173_s19 = smov 256  }
   0xe   :  { %s47_s18 = sshll.u32 %s1172_s17, 4  ;;  %s1174_s20 = smov 16   ;;  %s48_s18 = int_to_ptr.vmem [resolvable:$true] %s47_s18 }
   0xf   :  { %53 = dma.hbm_to_vmem [thread:$0]  %s46_s16, 4096, %s48_s18, [#allocation6], %s1173_s19, %s1173_s19, %s1174_s20  }
  0x10   :  { %s73_s22 = sshll.u32 %s1529_s5, 4  ;;  %s1175_s23 = smov [#allocation10]   ;;  %s74_s22 = int_to_ptr.hbm [resolvable:$true] %s73_s22 }
  0x11   :  { %s75_s24 = sshll.u32 %s1175_s23, 4  ;;  %s76_s24 = int_to_ptr.vmem [resolvable:$true] %s75_s24 }
  0x12   :  { %81 = dma.hbm_to_vmem [thread:$0]  %s74_s22, 2048, %s76_s24, [#allocation9], %s1166_s29, %s1166_s29, %s1167_s30  }
  0x13   :  { %1157 = dma.done.wait [#allocation3], 1024  }
  0x14   :  { %1158 = vsyncadd [#allocation3], 4294966272 }
  0x15   :  { %1159 = dma.done.wait [#allocation6], 5120  }
  0x16   :  { %1160 = vsyncadd [#allocation6], 4294962176 }
  0x17   :  { %1161 = dma.done.wait [#allocation9], 8192  }
  0x18   :  { %1162 = vsyncadd [#allocation9], 4294959104  ;;  %v148_v0 = vld [vmem:[#allocation7 + $0xf0] sm:$0xff]  ;;  %v146_v1 = vld [vmem:[#allocation7 + $0xe0] sm:$0xff]  ;;  %s850_s28 = sshll.u32 %s1530_s6, 4  ;;  %s851_s28 = int_to_ptr.hbm [resolvable:$true] %s850_s28 }
  0x19   :  { %881 = vmatpush.msra.mxu2 %v148_v0  ;;  %150 = vmatpush.msra.mxu0 %v148_v0  ;;  %v144_v2 = vld [vmem:[#allocation7 + $0xd0] sm:$0xff]  ;;  %v142_v3 = vld [vmem:[#allocation7 + $0xc0] sm:$0xff]  ;;  %v149_v14 = vld [vmem:[#allocation7 + $0xf8] sm:$0xff] }
  0x1a   :  { %v140_v4 = vld [vmem:[#allocation7 + $0xb0] sm:$0xff]  ;;  %v138_v5 = vld [vmem:[#allocation7 + $0xa0] sm:$0xff]  ;;  %897 = vmatpush.msra.mxu3 %v149_v14  ;;  %v147_v16 = vld [vmem:[#allocation7 + $0xe8] sm:$0xff]  ;;  %191 = vmatpush.msra.mxu1 %v149_v14 }
  0x1b   :  { %882 = vmatpush.msra.mxu2 %v146_v1  ;;  %151 = vmatpush.msra.mxu0 %v146_v1  ;;  %v136_v6 = vld [vmem:[#allocation7 + $0x90] sm:$0xff]  ;;  %v134_v7 = vld [vmem:[#allocation7 + $0x80] sm:$0xff]  ;;  %v145_v18 = vld [vmem:[#allocation7 + $0xd8] sm:$0xff] }
  0x1c   :  { %v132_v8 = vld [vmem:[#allocation7 + $0x70] sm:$0xff]  ;;  %v130_v9 = vld [vmem:[#allocation7 + $0x60] sm:$0xff]  ;;  %898 = vmatpush.msra.mxu3 %v147_v16  ;;  %192 = vmatpush.msra.mxu1 %v147_v16  ;;  %v277_v20 = vld [vmem:[#allocation8 + $0x168] sm:$0xff] }
  0x1d   :  { %883 = vmatpush.msra.mxu2 %v144_v2  ;;  %152 = vmatpush.msra.mxu0 %v144_v2  ;;  %v128_v10 = vld [vmem:[#allocation7 + $0x50] sm:$0xff]  ;;  %v126_v11 = vld [vmem:[#allocation7 + $0x40] sm:$0xff]  ;;  %v143_v21 = vld [vmem:[#allocation7 + $0xc8] sm:$0xff] }
  0x1e   :  { %v124_v12 = vld [vmem:[#allocation7 + $0x30] sm:$0xff]  ;;  %v122_v13 = vld [vmem:[#allocation7 + $0x20] sm:$0xff]  ;;  %899 = vmatpush.msra.mxu3 %v145_v18  ;;  %193 = vmatpush.msra.mxu1 %v145_v18  ;;  %v141_v23 = vld [vmem:[#allocation7 + $0xb8] sm:$0xff] }
  0x1f   :  { %884 = vmatpush.msra.mxu2 %v142_v3  ;;  %153 = vmatpush.msra.mxu0 %v142_v3  ;;  %v120_v15 = vld [vmem:[#allocation7 + $0x10] sm:$0xff]  ;;  %v118_v17 = vld [vmem:[#allocation7] sm:$0xff]  ;;  %v139_v24 = vld [vmem:[#allocation7 + $0xa8] sm:$0xff] }
  0x20   :  { %v1236_v19 = vld [vmem:[#allocation2 + $0x20] sm:$0xff]  ;;  %900 = vmatpush.msra.mxu3 %v143_v21  ;;  %v274_v22 = vld [vmem:[#allocation8 + $0x150] sm:$0xff]  ;;  %v271_v26 = vld [vmem:[#allocation8 + $0x138] sm:$0xff]  ;;  %194 = vmatpush.msra.mxu1 %v143_v21 }
  0x21   :  { %885 = vmatpush.msra.mxu2 %v140_v4  ;;  %154 = vmatpush.msra.mxu0 %v140_v4  ;;  %v1239_v25 = vld [vmem:[#allocation2] sm:$0xff]  ;;  %v137_v27 = vld [vmem:[#allocation7 + $0x98] sm:$0xff]  ;;  %v135_v29 = vld [vmem:[#allocation7 + $0x88] sm:$0xff] }
  0x22   :  { %901 = vmatpush.msra.mxu3 %v141_v23  ;;  %v268_v28 = vld [vmem:[#allocation8 + $0x120] sm:$0xff]  ;;  %195 = vmatpush.msra.mxu1 %v141_v23  ;;  %v1242_v30 = vld [vmem:[#allocation2 + $0x28] sm:$0xff]  ;;  %v262_v32 = vld [vmem:[#allocation8 + $0xf0] sm:$0xff] }
  0x23   :  { %886 = vmatpush.msra.mxu2 %v138_v5  ;;  %155 = vmatpush.msra.mxu0 %v138_v5  ;;  %v265_v31 = vld [vmem:[#allocation8 + $0x108] sm:$0xff]  ;;  %v133_v33 = vld [vmem:[#allocation7 + $0x78] sm:$0xff]  ;;  %v256_v38 = vld [vmem:[#allocation8 + $0xc0] sm:$0xff] }
  0x24   :  { %902 = vmatpush.msra.mxu3 %v139_v24  ;;  %196 = vmatpush.msra.mxu1 %v139_v24  ;;  %v131_v34 = vld [vmem:[#allocation7 + $0x68] sm:$0xff]  ;;  %v259_v36 = vld [vmem:[#allocation8 + $0xd8] sm:$0xff]  ;;  %v1248_v40 = vld [vmem:[#allocation2 + $0x30] sm:$0xff] }
  0x25   :  { %887 = vmatpush.msra.mxu2 %v136_v6  ;;  %156 = vmatpush.msra.mxu0 %v136_v6  ;;  %v1245_v35 = vld [vmem:[#allocation2 + $0x8] sm:$0xff]  ;;  %v129_v37 = vld [vmem:[#allocation7 + $0x58] sm:$0xff]  ;;  %v250_v42 = vld [vmem:[#allocation8 + $0x90] sm:$0xff] }
  0x26   :  { %903 = vmatpush.msra.mxu3 %v137_v27  ;;  %197 = vmatpush.msra.mxu1 %v137_v27  ;;  %v127_v39 = vld [vmem:[#allocation7 + $0x48] sm:$0xff]  ;;  %v125_v43 = vld [vmem:[#allocation7 + $0x38] sm:$0xff]  ;;  %v1251_v45 = vld [vmem:[#allocation2 + $0x10] sm:$0xff] }
  0x27   :  { %888 = vmatpush.msra.mxu2 %v134_v7  ;;  %157 = vmatpush.msra.mxu0 %v134_v7  ;;  %v253_v41 = vld [vmem:[#allocation8 + $0xa8] sm:$0xff]  ;;  %v247_v46 = vld [vmem:[#allocation8 + $0x78] sm:$0xff]  ;;  %v244_v48 = vld [vmem:[#allocation8 + $0x60] sm:$0xff] }
  0x28   :  { %904 = vmatpush.msra.mxu3 %v135_v29  ;;  %198 = vmatpush.msra.mxu1 %v135_v29  ;;  %v123_v44 = vld [vmem:[#allocation7 + $0x28] sm:$0xff]  ;;  %v121_v47 = vld [vmem:[#allocation7 + $0x18] sm:$0xff]  ;;  %v238_v52 = vld [vmem:[#allocation8 + $0x30] sm:$0xff] }
  0x29   :  { %889 = vmatpush.msra.mxu2 %v132_v8  ;;  %158 = vmatpush.msra.mxu0 %v132_v8  ;;  %v119_v49 = vld [vmem:[#allocation7 + $0x8] sm:$0xff]  ;;  %v1254_v50 = vld [vmem:[#allocation2 + $0x38] sm:$0xff]  ;;  %v278_v53 = vld [vmem:[#allocation8 + $0x170] sm:$0xff] }
  0x2a   :  { %905 = vmatpush.msra.mxu3 %v133_v33  ;;  %199 = vmatpush.msra.mxu1 %v133_v33  ;;  %v241_v51 = vld [vmem:[#allocation8 + $0x48] sm:$0xff]  ;;  %v275_v54 = vld [vmem:[#allocation8 + $0x158] sm:$0xff]  ;;  %v272_v57 = vld [vmem:[#allocation8 + $0x140] sm:$0xff] }
  0x2b   :  { %890 = vmatpush.msra.mxu2 %v130_v9  ;;  %159 = vmatpush.msra.mxu0 %v130_v9  ;;  %v1258_v55 = vld [vmem:[#allocation2 + $0x18] sm:$0xff]  ;;  %v232_v58 = vld [vmem:[#allocation8] sm:$0xff]  ;;  %v269_v59 = vld [vmem:[#allocation8 + $0x128] sm:$0xff] }
  0x2c   :  { %906 = vmatpush.msra.mxu3 %v131_v34  ;;  %200 = vmatpush.msra.mxu1 %v131_v34  ;;  %v235_v56 = vld [vmem:[#allocation8 + $0x18] sm:$0xff]  ;;  %v1261_v60 = vld [vmem:[#allocation5] sm:$0xff]  ;;  %v266_v61 = vld [vmem:[#allocation8 + $0x110] sm:$0xff] }
  0x2d   :  { %891 = vmatpush.msra.mxu2 %v128_v10  ;;  %160 = vmatpush.msra.mxu0 %v128_v10  ;;  %v263_v62 = vld [vmem:[#allocation8 + $0xf8] sm:$0xff]  ;;  %v260_v63 = vld [vmem:[#allocation8 + $0xe0] sm:$0xff]  ;;  %v257_v0 = vld [vmem:[#allocation8 + $0xc8] sm:$0xff] }
  0x2e   :  { %907 = vmatpush.msra.mxu3 %v129_v37  ;;  %201 = vmatpush.msra.mxu1 %v129_v37  ;;  %v1266_v1 = vld [vmem:[#allocation5 + $0x8] sm:$0xff]  ;;  %v254_v2 = vld [vmem:[#allocation8 + $0xb0] sm:$0xff]  ;;  %v251_v3 = vld [vmem:[#allocation8 + $0x98] sm:$0xff] }
  0x2f   :  { %892 = vmatpush.msra.mxu2 %v126_v11  ;;  %161 = vmatpush.msra.mxu0 %v126_v11  ;;  %v248_v4 = vld [vmem:[#allocation8 + $0x80] sm:$0xff]  ;;  %v245_v5 = vld [vmem:[#allocation8 + $0x68] sm:$0xff]  ;;  %v1271_v6 = vld [vmem:[#allocation5 + $0x10] sm:$0xff] }
  0x30   :  { %908 = vmatpush.msra.mxu3 %v127_v39  ;;  %202 = vmatpush.msra.mxu1 %v127_v39  ;;  %v242_v7 = vld [vmem:[#allocation8 + $0x50] sm:$0xff]  ;;  %v239_v8 = vld [vmem:[#allocation8 + $0x38] sm:$0xff]  ;;  %v236_v9 = vld [vmem:[#allocation8 + $0x20] sm:$0xff] }
  0x31   :  { %893 = vmatpush.msra.mxu2 %v124_v12  ;;  %162 = vmatpush.msra.mxu0 %v124_v12  ;;  %v233_v10 = vld [vmem:[#allocation8 + $0x8] sm:$0xff]  ;;  %v1276_v11 = vld [vmem:[#allocation5 + $0x18] sm:$0xff]  ;;  %v1281_v12 = vld [vmem:[#allocation5 + $0x20] sm:$0xff] }
  0x32   :  { %909 = vmatpush.msra.mxu3 %v125_v43  ;;  %203 = vmatpush.msra.mxu1 %v125_v43  ;;  %v1289_v14 = vld [vmem:[#allocation5 + $0x30] sm:$0xff]  ;;  %v276_v18 = vld [vmem:[#allocation8 + $0x160] sm:$0xff]  ;;  %v273_v21 = vld [vmem:[#allocation8 + $0x148] sm:$0xff] }
  0x33   :  { %894 = vmatpush.msra.mxu2 %v122_v13  ;;  %163 = vmatpush.msra.mxu0 %v122_v13  ;;  %v1285_v13 = vld [vmem:[#allocation5 + $0x28] sm:$0xff]  ;;  %v270_v23 = vld [vmem:[#allocation8 + $0x130] sm:$0xff]  ;;  %v267_v27 = vld [vmem:[#allocation8 + $0x118] sm:$0xff] }
  0x34   :  { %910 = vmatpush.msra.mxu3 %v123_v44  ;;  %204 = vmatpush.msra.mxu1 %v123_v44  ;;  %v752_v24 = vld [vmem:[#allocation10 + $0x68] sm:$0xff]  ;;  %v264_v29 = vld [vmem:[#allocation8 + $0x100] sm:$0xff]  ;;  %v749_v33 = vld [vmem:[#allocation10 + $0x50] sm:$0xff] }
  0x35   :  { %895 = vmatpush.msra.mxu2 %v120_v15  ;;  %164 = vmatpush.msra.mxu0 %v120_v15  ;;  %v1293_v15 = vld [vmem:[#allocation5 + $0x38] sm:$0xff]  ;;  %v258_v34 = vld [vmem:[#allocation8 + $0xd0] sm:$0xff]  ;;  %v747_v39 = vld [vmem:[#allocation10 + $0x40] sm:$0xff] }
  0x36   :  { %911 = vmatpush.msra.mxu3 %v121_v47  ;;  %205 = vmatpush.msra.mxu1 %v121_v47  ;;  %v249_v43 = vld [vmem:[#allocation8 + $0x88] sm:$0xff]  ;;  %v745_v44 = vld [vmem:[#allocation10 + $0x30] sm:$0xff] }
  0x37   :  { %896 = vmatpush.msra.mxu2 %v118_v17  ;;  %165 = vmatpush.msra.mxu0 %v118_v17  ;;  %v279_v17 = vld [vmem:[#allocation8 + $0x178] sm:$0xff]  ;;  %v744_v47 = vld [vmem:[#allocation10 + $0x28] sm:$0xff] }
  0x38   :  { %178 = vmatmul.f32.vlgmr.msra.gmra.mxu2 %v1236_v19  ;;  %166 = vmatmul.f32.vlgmr.msra.gmra.mxu0 %v1239_v25 }
  0x39   :  { %288 = vmatpush.msrb.mxu2 %v277_v20  ;;  %912 = vmatpush.msra.mxu3 %v119_v49  ;;  %v754_v20 = vld [vmem:[#allocation10 + $0x78] sm:$0xff] }
  0x3a   :  { %219 = vmatmul.f32.vlgmr.msra.gmra.mxu3 %v1236_v19  ;;  %206 = vmatpush.msra.mxu1 %v119_v49  ;;  %v243_v49 = vld [vmem:[#allocation8 + $0x58] sm:$0xff] }
  0x3b   :  { %289 = vmatpush.msrb.mxu2 %v274_v22  ;;  %329 = vmatpush.msrb.mxu3 %v278_v53  ;;  %v753_v22 = vld [vmem:[#allocation10 + $0x70] sm:$0xff] }
  0x3c   :  { %207 = vmatmul.f32.vlgmr.msra.gmra.mxu1 %v1239_v25  ;;  %370 = vmatpush.msrb.mxu0 %v279_v17 }
  0x3d   :  { %290 = vmatpush.msrb.mxu2 %v271_v26  ;;  %330 = vmatpush.msrb.mxu3 %v275_v54  ;;  %v240_v54 = vld [vmem:[#allocation8 + $0x40] sm:$0xff] }
  0x3e   :  { %371 = vmatpush.msrb.mxu0 %v276_v18  ;;  %755 = vmatpush.msrb.mxu1 %v754_v20 }
  0x3f   :  { %291 = vmatpush.msrb.mxu2 %v268_v28  ;;  %331 = vmatpush.msrb.mxu3 %v272_v57  ;;  %v751_v28 = vld [vmem:[#allocation10 + $0x60] sm:$0xff] }
  0x40   :  { %181 = vmatmul.f32.gmra.mxu2 %v1242_v30  ;;  %169 = vmatmul.f32.gmra.mxu0 %v1245_v35 }
  0x41   :  { %292 = vmatpush.msrb.mxu2 %v265_v31  ;;  %332 = vmatpush.msrb.mxu3 %v269_v59  ;;  %v750_v31 = vld [vmem:[#allocation10 + $0x58] sm:$0xff]  ;;  %v741_v59 = vld [vmem:[#allocation10 + $0x10] sm:$0xff] }
  0x42   :  { %222 = vmatmul.f32.gmra.mxu3 %v1242_v30  ;;  %372 = vmatpush.msrb.mxu0 %v273_v21 }
  0x43   :  { %293 = vmatpush.msrb.mxu2 %v262_v32  ;;  %333 = vmatpush.msrb.mxu3 %v266_v61  ;;  %v261_v32 = vld [vmem:[#allocation8 + $0xe8] sm:$0xff]  ;;  %v234_v61 = vld [vmem:[#allocation8 + $0x10] sm:$0xff] }
  0x44   :  { %210 = vmatmul.f32.gmra.mxu1 %v1245_v35  ;;  %373 = vmatpush.msrb.mxu0 %v270_v23 }
  0x45   :  { %294 = vmatpush.msrb.mxu2 %v259_v36  ;;  %334 = vmatpush.msrb.mxu3 %v263_v62  ;;  %v748_v36 = vld [vmem:[#allocation10 + $0x48] sm:$0xff] }
  0x46   :  { %756 = vmatpush.msrb.mxu1 %v753_v22  ;;  %374 = vmatpush.msrb.mxu0 %v267_v27  ;;  %v740_v62 = vld [vmem:[#allocation10 + $0x8] sm:$0xff] }
  0x47   :  { %295 = vmatpush.msrb.mxu2 %v256_v38  ;;  %335 = vmatpush.msrb.mxu3 %v260_v63  ;;  %v255_v38 = vld [vmem:[#allocation8 + $0xb8] sm:$0xff] }
  0x48   :  { %184 = vmatmul.f32.gmra.mxu2 %v1248_v40  ;;  %172 = vmatmul.f32.gmra.mxu0 %v1251_v45 }
  0x49   :  { %296 = vmatpush.msrb.mxu2 %v253_v41  ;;  %336 = vmatpush.msrb.mxu3 %v257_v0  ;;  %v252_v41 = vld [vmem:[#allocation8 + $0xa0] sm:$0xff] }
  0x4a   :  { %225 = vmatmul.f32.gmra.mxu3 %v1248_v40  ;;  %757 = vmatpush.msrb.mxu1 %v752_v24 }
  0x4b   :  { %297 = vmatpush.msrb.mxu2 %v250_v42  ;;  %337 = vmatpush.msrb.mxu3 %v254_v2  ;;  %v746_v42 = vld [vmem:[#allocation10 + $0x38] sm:$0xff]  ;;  %v739_v2 = vld [vmem:[#allocation10] sm:$0xff] }
  0x4c   :  { %213 = vmatmul.f32.gmra.mxu1 %v1251_v45  ;;  %375 = vmatpush.msrb.mxu0 %v264_v29 }
  0x4d   :  { %298 = vmatpush.msrb.mxu2 %v247_v46  ;;  %338 = vmatpush.msrb.mxu3 %v251_v3  ;;  %v246_v46 = vld [vmem:[#allocation8 + $0x70] sm:$0xff] }
  0x4e   :  { %758 = vmatpush.msrb.mxu1 %v751_v28  ;;  %376 = vmatpush.msrb.mxu0 %v261_v32 }
  0x4f   :  { %299 = vmatpush.msrb.mxu2 %v244_v48  ;;  %339 = vmatpush.msrb.mxu3 %v248_v4 }
  0x50   :  { %187 = vmatmul.f32.gmra.mxu2 %v1254_v50  ;;  %175 = vmatmul.f32.gmra.mxu0 %v1258_v55 }
  0x51   :  { %300 = vmatpush.msrb.mxu2 %v241_v51  ;;  %340 = vmatpush.msrb.mxu3 %v245_v5  ;;  %v743_v51 = vld [vmem:[#allocation10 + $0x20] sm:$0xff] }
  0x52   :  { %228 = vmatmul.f32.gmra.mxu3 %v1254_v50  ;;  %759 = vmatpush.msrb.mxu1 %v750_v31 }
  0x53   :  { %301 = vmatpush.msrb.mxu2 %v238_v52  ;;  %341 = vmatpush.msrb.mxu3 %v242_v7  ;;  %v1311_v52 = vld [vmem:[%s1528_s4] sm:$0x7]  ;;  %s1176_s4 = smov [#allocation11]  }
  0x54   :  { %216 = vmatmul.f32.gmra.mxu1 %v1258_v55  ;;  %377 = vmatpush.msrb.mxu0 %v258_v34  ;;  %v1314_v57 = vperm.slane %v1311_v52, 0  ;;  %s848_s25 = sshll.u32 %s1176_s4, 4  ;;  %s849_s25 = int_to_ptr.vmem [resolvable:$true] %s848_s25 }
  0x55   :  { %302 = vmatpush.msrb.mxu2 %v235_v56  ;;  %342 = vmatpush.msrb.mxu3 %v239_v8  ;;  %v742_v56 = vld [vmem:[#allocation10 + $0x18] sm:$0xff] }
  0x56   :  { %760 = vmatpush.msrb.mxu1 %v749_v33  ;;  %378 = vmatpush.msrb.mxu0 %v255_v38 }
  0x57   :  { %303 = vmatpush.msrb.mxu2 %v232_v58  ;;  %343 = vmatpush.msrb.mxu3 %v236_v9  ;;  %v237_v58 = vld [vmem:[#allocation8 + $0x28] sm:$0xff] }
  0x58   :  { %304 = vmatmul.f32.vlgmr.msrb.gmra.mxu2 %v1261_v60  ;;  %761 = vmatpush.msrb.mxu1 %v748_v36 }
  0x59   :  { %344 = vmatpush.msrb.mxu3 %v233_v10  ;;  %379 = vmatpush.msrb.mxu0 %v252_v41 }
  0x5a   :  { %345 = vmatmul.f32.vlgmr.msrb.gmra.mxu3 %v1261_v60  ;;  %762 = vmatpush.msrb.mxu1 %v747_v39 }
  0x5b   :  { %380 = vmatpush.msrb.mxu0 %v249_v43 }
  0x5c   :  { %763 = vmatpush.msrb.mxu1 %v746_v42 }
  0x5d   :  { %381 = vmatpush.msrb.mxu0 %v246_v46 }
  0x5e   :  { %764 = vmatpush.msrb.mxu1 %v745_v44 }
  0x5f   :  { %382 = vmatpush.msrb.mxu0 %v243_v49 }
  0x60   :  { %307 = vmatmul.f32.gmra.mxu2 %v1266_v1  ;;  %765 = vmatpush.msrb.mxu1 %v744_v47 }
  0x61   :  { %383 = vmatpush.msrb.mxu0 %v240_v54 }
  0x62   :  { %348 = vmatmul.f32.gmra.mxu3 %v1266_v1  ;;  %766 = vmatpush.msrb.mxu1 %v743_v51 }
  0x63   :  { %384 = vmatpush.msrb.mxu0 %v237_v58 }
  0x64   :  { %767 = vmatpush.msrb.mxu1 %v742_v56 }
  0x65   :  { %385 = vmatpush.msrb.mxu0 %v234_v61 }
  0x66   :  { %768 = vmatpush.msrb.mxu1 %v741_v59  ;;  %386 = vmatmul.f32.vlgmr.msrb.gmra.mxu0 %v1261_v60 }
  0x68   :  { %310 = vmatmul.f32.gmra.mxu2 %v1271_v6  ;;  %769 = vmatpush.msrb.mxu1 %v740_v62 }
  0x6a   :  { %351 = vmatmul.f32.gmra.mxu3 %v1271_v6  ;;  %770 = vmatpush.msrb.mxu1 %v739_v2 }
  0x6e   :  { %389 = vmatmul.f32.gmra.mxu0 %v1266_v1 }
  0x70   :  { %313 = vmatmul.f32.gmra.mxu2 %v1276_v11 }
  0x72   :  { %354 = vmatmul.f32.gmra.mxu3 %v1276_v11 }
  0x76   :  { %392 = vmatmul.f32.gmra.mxu0 %v1271_v6 }
  0x78   :  { %316 = vmatmul.f32.gmra.mxu2 %v1281_v12 }
  0x7a   :  { %357 = vmatmul.f32.gmra.mxu3 %v1281_v12 }
  0x7e   :  { %395 = vmatmul.f32.gmra.mxu0 %v1276_v11 }
  0x80   :  { %319 = vmatmul.f32.gmra.mxu2 %v1285_v13 }
  0x82   :  { %360 = vmatmul.f32.gmra.mxu3 %v1285_v13 }
  0x86   :  { %398 = vmatmul.f32.gmra.mxu0 %v1281_v12 }
  0x88   :  { %322 = vmatmul.f32.gmra.mxu2 %v1289_v14 }
  0x8a   :  { %363 = vmatmul.f32.gmra.mxu3 %v1289_v14 }
  0x8e   :  { %401 = vmatmul.f32.gmra.mxu0 %v1285_v13 }
  0x90   :  { %325 = vmatmul.f32.gmra.mxu2 %v1293_v15 }
  0x92   :  { %366 = vmatmul.f32.gmra.mxu3 %v1293_v15 }
  0x96   :  { %404 = vmatmul.f32.gmra.mxu0 %v1289_v14 }
  0x9e   :  { %407 = vmatmul.f32.gmra.mxu0 %v1293_v15 }
  0xb5   :  { %v167_v53 = vpop.f32.mrf.mxu0 }
  0xbb   :  { %v1300_v16 = vpop.f32.mrf.mxu2 }
  0xbd   :  { %v170_v4 = vpop.f32.mrf.mxu0 }
  0xc3   :  { %v1302_v26 = vpop.f32.mrf.mxu2 }
  0xc5   :  { %v173_v20 = vpop.f32.mrf.mxu0 }
  0xcb   :  { %v1304_v37 = vpop.f32.mrf.mxu2 }
  0xcd   :  { %v176_v31 = vpop.f32.mrf.mxu0 }
  0xd3   :  { %v1306_v48 = vpop.f32.mrf.mxu2 }
  0xdb   :  { %v305_v63 = vpop.f32.mrf.mxu2 }
  0xdc   :  { %v306_v0 = vadd.f32 %v305_v63, %v1314_v57 }
  0xde   :  { %v411_v3 = vadd.f32 %v306_v0, %v167_v53 }
  0xe0   :  { %v865_v5 = vmul.f32 -1.442695, %v411_v3 }
  0xe2   :  { %925 = vpow2.f32 %v865_v5 }
  0xe3   :  { %v308_v7 = vpop.f32.mrf.mxu2 }
  0xe4   :  { %v309_v8 = vadd.f32 %v308_v7, %v1314_v57 }
  0xe6   :  { %v412_v9 = vadd.f32 %v309_v8, %v170_v4 }
  0xe8   :  { %v926_v10 = vpop.eup %925  ;;  %v866_v17 = vmul.f32 -1.442695, %v412_v9 }
  0xe9   :  { %v443_v18 = vadd.f32 1.0, %v926_v10 }
  0xea   :  { %927 = vpow2.f32 %v866_v17 }
  0xeb   :  { %929 = vrcp.f32 %v443_v18  ;;  %v311_v21 = vpop.f32.mrf.mxu2  ;;  %v462_v34 = vand.u32 2147483648, %v443_v18  ;;  %v460_v6 = vand.u32 2147483647, %v443_v18  ;;  %vm456_vm1 = vweird.f32 %v443_v18 }
  0xec   :  { %v312_v60 = vadd.f32 %v311_v21, %v1314_v57 }
  0xed   :  { %v463_v46 = vor.u32 1.1754944e-38, %v462_v34  ;;  %vm461_vm3 = vcmp.eq.f32.partialorder %v460_v6, 8.507059e+37  ;;  %v1336_v6 = vpop.f32.mrf.mxu3 }
  0xee   :  { %v413_v22 = vadd.f32 %v312_v60, %v173_v20 }
  0xf0   :  { %v928_v23 = vpop.eup %927  ;;  %v867_v24 = vmul.f32 -1.442695, %v413_v22 }
  0xf1   :  { %v930_v27 = vpop.eup %929  ;;  %v444_v28 = vadd.f32 1.0, %v928_v23 }
  0xf2   :  { %v452_v29 = vmul.f32 %v930_v27, %v443_v18  ;;  %931 = vpow2.f32 %v867_v24  ;;  %vm457_vm0 = vweird.f32 %v930_v27 }
  0xf3   :  { %933 = vrcp.f32 %v444_v28  ;;  %v314_v1 = vpop.f32.mrf.mxu2  ;;  %vm458_vm2 = vmor %vm456_vm1, %vm457_vm0  ;;  %v477_v58 = vand.u32 2147483648, %v444_v28  ;;  %v475_v62 = vand.u32 2147483647, %v444_v28  ;;  %vm471_vm5 = vweird.f32 %v444_v28 }
  0xf4   :  { %v315_v32 = vadd.f32 %v314_v1, %v1314_v57  ;;  %v453_v33 = vsub.f32 1.0, %v452_v29 }
  0xf5   :  { %v478_v5 = vor.u32 1.1754944e-38, %v477_v58  ;;  %vm476_vm7 = vcmp.eq.f32.partialorder %v475_v62, 8.507059e+37 }
  0xf6   :  { %v414_v36 = vadd.f32 %v315_v32, %v176_v31  ;;  %v454_v38 = vmul.f32 %v930_v27, %v453_v33 }
  0xf8   :  { %v932_v39 = vpop.eup %931  ;;  %v868_v41 = vmul.f32 -1.442695, %v414_v36  ;;  %v455_v42 = vadd.f32 %v930_v27, %v454_v38 }
  0xf9   :  { %v934_v43 = vpop.eup %933  ;;  %v445_v44 = vadd.f32 1.0, %v932_v39 }
  0xfa   :  { %935 = vpow2.f32 %v868_v41  ;;  %v459_v47 = vsel %vm458_vm2, %v930_v27, %v455_v42  ;;  %v467_v49 = vmul.f32 %v934_v43, %v444_v28  ;;  %vm472_vm4 = vweird.f32 %v934_v43 }
  0xfb   :  { %937 = vrcp.f32 %v445_v44  ;;  %v317_v51 = vpop.f32.mrf.mxu2  ;;  %v464_v11 = vsel %vm461_vm3, %v463_v46, %v459_v47  ;;  %vm473_vm6 = vmor %vm471_vm5, %vm472_vm4  ;;  %v492_v17 = vand.u32 2147483648, %v445_v44  ;;  %v490_v21 = vand.u32 2147483647, %v445_v44 }
  0xfc   :  { %v318_v53 = vadd.f32 %v317_v51, %v1314_v57  ;;  %v731_v54 = vmul.f32 %v464_v11, %v1239_v25  ;;  %v468_v56 = vsub.f32 1.0, %v467_v49  ;;  %vm486_vm9 = vweird.f32 %v445_v44 }
  0xfd   :  { %v493_v28 = vor.u32 1.1754944e-38, %v492_v17  ;;  %vm491_vm11 = vcmp.eq.f32.partialorder %v490_v21, 8.507059e+37 }
  0xfe   :  { %v415_v59 = vadd.f32 %v318_v53, %v1300_v16  ;;  %771 = vmatmul.f32.vlgmr.msrb.gmra.mxu1 %v731_v54  ;;  %v469_v61 = vmul.f32 %v934_v43, %v468_v56 }
 0x100   :  { %v936_v63 = vpop.eup %935  ;;  %v869_v0 = vmul.f32 -1.442695, %v415_v59  ;;  %v470_v2 = vadd.f32 %v934_v43, %v469_v61 }
 0x101   :  { %v938_v3 = vpop.eup %937  ;;  %v446_v4 = vadd.f32 1.0, %v936_v63 }
 0x102   :  { %939 = vpow2.f32 %v869_v0  ;;  %v474_v25 = vsel %vm473_vm6, %v934_v43, %v470_v2  ;;  %v482_v7 = vmul.f32 %v938_v3, %v445_v44  ;;  %vm487_vm8 = vweird.f32 %v938_v3  ;;  %v1342_v0 = vpop.f32.mrf.mxu3 }
 0x103   :  { %941 = vrcp.f32 %v446_v4  ;;  %v320_v12 = vpop.f32.mrf.mxu2  ;;  %v479_v8 = vsel %vm476_vm7, %v478_v5, %v474_v25  ;;  %vm488_vm10 = vmor %vm486_vm9, %vm487_vm8  ;;  %v507_v33 = vand.u32 2147483648, %v446_v4  ;;  %v505_v38 = vand.u32 2147483647, %v446_v4 }
 0x104   :  { %v321_v16 = vadd.f32 %v320_v12, %v1314_v57  ;;  %v732_v9 = vmul.f32 %v479_v8, %v1245_v35  ;;  %v483_v10 = vsub.f32 1.0, %v482_v7  ;;  %vm501_vm13 = vweird.f32 %v446_v4 }
 0x105   :  { %vm506_vm15 = vcmp.eq.f32.partialorder %v505_v38, 8.507059e+37 }
 0x106   :  { %v416_v18 = vadd.f32 %v321_v16, %v1302_v26  ;;  %774 = vmatmul.f32.gmra.mxu1 %v732_v9  ;;  %v484_v20 = vmul.f32 %v938_v3, %v483_v10 }
 0x108   :  { %v940_v60 = vpop.eup %939  ;;  %v870_v22 = vmul.f32 -1.442695, %v416_v18  ;;  %v485_v23 = vadd.f32 %v938_v3, %v484_v20 }
 0x109   :  { %v942_v24 = vpop.eup %941  ;;  %v447_v27 = vadd.f32 1.0, %v940_v60 }
 0x10a   :  { %943 = vpow2.f32 %v870_v22  ;;  %v489_v35 = vsel %vm488_vm10, %v938_v3, %v485_v23  ;;  %v497_v29 = vmul.f32 %v942_v24, %v446_v4  ;;  %vm502_vm12 = vweird.f32 %v942_v24  ;;  %v1345_v20 = vpop.f32.mrf.mxu3 }
 0x10b   :  { %945 = vrcp.f32 %v447_v27  ;;  %v323_v13 = vpop.f32.mrf.mxu2  ;;  %v494_v1 = vsel %vm491_vm11, %v493_v28, %v489_v35  ;;  %vm503_vm14 = vmor %vm501_vm13, %vm502_vm12  ;;  %v522_v53 = vand.u32 2147483648, %v447_v27  ;;  %v520_v58 = vand.u32 2147483647, %v447_v27 }
 0x10c   :  { %v324_v26 = vadd.f32 %v323_v13, %v1314_v57  ;;  %v733_v31 = vmul.f32 %v494_v1, %v1251_v45  ;;  %v498_v32 = vsub.f32 1.0, %v497_v29  ;;  %v508_v45 = vor.u32 1.1754944e-38, %v507_v33 }
 0x10d   :  { %vm516_vm1 = vweird.f32 %v447_v27  ;;  %vm521_vm3 = vcmp.eq.f32.partialorder %v520_v58, 8.507059e+37 }
 0x10e   :  { %v417_v34 = vadd.f32 %v324_v26, %v1304_v37  ;;  %777 = vmatmul.f32.gmra.mxu1 %v733_v31  ;;  %v499_v36 = vmul.f32 %v942_v24, %v498_v32 }
 0x110   :  { %v944_v39 = vpop.eup %943  ;;  %v871_v41 = vmul.f32 -1.442695, %v417_v34  ;;  %v500_v42 = vadd.f32 %v942_v24, %v499_v36 }
 0x111   :  { %v946_v43 = vpop.eup %945  ;;  %v448_v44 = vadd.f32 1.0, %v944_v39 }
 0x112   :  { %947 = vpow2.f32 %v871_v41  ;;  %v504_v46 = vsel %vm503_vm14, %v942_v24, %v500_v42  ;;  %v512_v14 = vmul.f32 %v946_v43, %v447_v27  ;;  %vm517_vm0 = vweird.f32 %v946_v43  ;;  %v1349_v32 = vpop.f32.mrf.mxu3 }
 0x113   :  { %949 = vrcp.f32 %v448_v44  ;;  %v326_v37 = vpop.f32.mrf.mxu2  ;;  %v509_v47 = vsel %vm506_vm15, %v508_v45, %v504_v46  ;;  %vm518_vm2 = vmor %vm516_vm1, %vm517_vm0  ;;  %v537_v5 = vand.u32 2147483648, %v448_v44  ;;  %v535_v7 = vand.u32 2147483647, %v448_v44 }
 0x114   :  { %v327_v49 = vadd.f32 %v326_v37, %v1314_v57  ;;  %v734_v51 = vmul.f32 %v509_v47, %v1258_v55  ;;  %v513_v11 = vsub.f32 1.0, %v512_v14  ;;  %v523_v55 = vor.u32 1.1754944e-38, %v522_v53 }
 0x115   :  { %vm531_vm5 = vweird.f32 %v448_v44  ;;  %v538_v10 = vor.u32 1.1754944e-38, %v537_v5  ;;  %vm536_vm7 = vcmp.eq.f32.partialorder %v535_v7, 8.507059e+37  ;;  %v1353_v45 = vperm.slane %v1311_v52, 1 }
 0x116   :  { %v418_v54 = vadd.f32 %v327_v49, %v1306_v48  ;;  %780 = vmatmul.f32.gmra.mxu1 %v734_v51  ;;  %v514_v56 = vmul.f32 %v946_v43, %v513_v11 }
 0x118   :  { %v948_v59 = vpop.eup %947  ;;  %v872_v61 = vmul.f32 -1.442695, %v418_v54  ;;  %v515_v62 = vadd.f32 %v946_v43, %v514_v56 }
 0x119   :  { %v950_v63 = vpop.eup %949  ;;  %v449_v57 = vadd.f32 1.0, %v948_v59 }
 0x11a   :  { %951 = vpow2.f32 %v872_v61  ;;  %v519_v2 = vsel %vm518_vm2, %v946_v43, %v515_v62  ;;  %v527_v15 = vmul.f32 %v950_v63, %v448_v44  ;;  %vm532_vm4 = vweird.f32 %v950_v63  ;;  %v346_v43 = vpop.f32.mrf.mxu3  ;;  %v208_v44 = vpop.f32.mrf.mxu1 }
 0x11b   :  { %953 = vrcp.f32 %v449_v57  ;;  %v524_v48 = vsel %vm521_vm3, %v523_v55, %v519_v2  ;;  %vm533_vm6 = vmor %vm531_vm5, %vm532_vm4  ;;  %v552_v22 = vand.u32 2147483648, %v449_v57  ;;  %v550_v24 = vand.u32 2147483647, %v449_v57 }
 0x11c   :  { %v735_v3 = vmul.f32 %v524_v48, %v1236_v19  ;;  %v528_v4 = vsub.f32 1.0, %v527_v15  ;;  %vm546_vm9 = vweird.f32 %v449_v57  ;;  %v347_v46 = vadd.f32 %v346_v43, %v1353_v45 }
 0x11d   :  { %v553_v35 = vor.u32 1.1754944e-38, %v552_v22  ;;  %vm551_vm11 = vcmp.eq.f32.partialorder %v550_v24, 8.507059e+37 }
 0x11e   :  { %783 = vmatmul.f32.gmra.mxu1 %v735_v3  ;;  %v529_v25 = vmul.f32 %v950_v63, %v528_v4  ;;  %v571_v37 = vadd.f32 %v347_v46, %v208_v44  ;;  %v387_v3 = vpop.f32.mrf.mxu0 }
 0x120   :  { %v952_v12 = vpop.eup %951  ;;  %v530_v8 = vadd.f32 %v950_v63, %v529_v25  ;;  %v873_v51 = vmul.f32 -1.442695, %v571_v37 }
 0x121   :  { %v954_v16 = vpop.eup %953  ;;  %v450_v9 = vadd.f32 1.0, %v952_v12 }
 0x122   :  { %v534_v17 = vsel %vm533_vm6, %v950_v63, %v530_v8  ;;  %v542_v18 = vmul.f32 %v954_v16, %v449_v57  ;;  %vm547_vm8 = vweird.f32 %v954_v16  ;;  %v211_v47 = vpop.f32.mrf.mxu1 }
 0x123   :  { %955 = vrcp.f32 %v450_v9  ;;  %v539_v19 = vsel %vm536_vm7, %v538_v10, %v534_v17  ;;  %vm548_vm10 = vmor %vm546_vm9, %vm547_vm8  ;;  %v565_v34 = vand.u32 2147483647, %v450_v9  ;;  %vm561_vm13 = vweird.f32 %v450_v9 }
 0x124   :  { %v736_v21 = vmul.f32 %v539_v19, %v1242_v30  ;;  %v543_v60 = vsub.f32 1.0, %v542_v18  ;;  %v567_v30 = vand.u32 2147483648, %v450_v9  ;;  %957 = vpow2.f32 %v873_v51 }
 0x125   :  { %vm566_vm15 = vcmp.eq.f32.partialorder %v565_v34, 8.507059e+37 }
 0x126   :  { %786 = vmatmul.f32.gmra.mxu1 %v736_v21  ;;  %v544_v23 = vmul.f32 %v954_v16, %v543_v60  ;;  %v568_v38 = vor.u32 1.1754944e-38, %v567_v30  ;;  %v390_v21 = vpop.f32.mrf.mxu0 }
 0x128   :  { %v545_v27 = vadd.f32 %v954_v16, %v544_v23 }
 0x129   :  { %v956_v28 = vpop.eup %955 }
 0x12a   :  { %v549_v29 = vsel %vm548_vm10, %v954_v16, %v545_v27  ;;  %v557_v13 = vmul.f32 %v956_v28, %v450_v9  ;;  %vm562_vm12 = vweird.f32 %v956_v28  ;;  %v214_v54 = vpop.f32.mrf.mxu1  ;;  %v958_v58 = vpop.eup %957 }
 0x12b   :  { %v554_v1 = vsel %vm551_vm11, %v553_v35, %v549_v29  ;;  %vm563_vm14 = vmor %vm561_vm13, %vm562_vm12  ;;  %v603_v61 = vadd.f32 1.0, %v958_v58 }
 0x12c   :  { %v737_v26 = vmul.f32 %v554_v1, %v1248_v40  ;;  %v558_v31 = vsub.f32 1.0, %v557_v13  ;;  %v349_v40 = vpop.f32.mrf.mxu3 }
 0x12d   :  { %v350_v49 = vadd.f32 %v349_v40, %v1353_v45  ;;  %vm616_vm0 = vweird.f32 %v603_v61  ;;  %v622_v35 = vand.u32 2147483648, %v603_v61  ;;  %v620_v1 = vand.u32 2147483647, %v603_v61 }
 0x12e   :  { %789 = vmatmul.f32.gmra.mxu1 %v737_v26  ;;  %v559_v33 = vmul.f32 %v956_v28, %v558_v31 }
 0x12f   :  { %v572_v53 = vadd.f32 %v350_v49, %v211_v47  ;;  %vm621_vm3 = vcmp.eq.f32.partialorder %v620_v1, 8.507059e+37 }
 0x130   :  { %v560_v36 = vadd.f32 %v956_v28, %v559_v33 }
 0x131   :  { %v874_v56 = vmul.f32 -1.442695, %v572_v53 }
 0x132   :  { %v564_v39 = vsel %vm563_vm14, %v956_v28, %v560_v36  ;;  %v217_v55 = vpop.f32.mrf.mxu1 }
 0x133   :  { %v569_v41 = vsel %vm566_vm15, %v568_v38, %v564_v39  ;;  %959 = vpow2.f32 %v874_v56 }
 0x134   :  { %v738_v42 = vmul.f32 %v569_v41, %v1254_v50  ;;  %v352_v14 = vpop.f32.mrf.mxu3  ;;  %961 = vrcp.f32 %v603_v61 }
 0x135   :  { %v353_v50 = vadd.f32 %v352_v14, %v1353_v45 }
 0x136   :  { %792 = vmatmul.f32.gmra.mxu1 %v738_v42  ;;  %v393_v42 = vpop.f32.mrf.mxu0 }
 0x137   :  { %v573_v59 = vadd.f32 %v353_v50, %v214_v54 }
 0x139   :  { %v875_v57 = vmul.f32 -1.442695, %v573_v59  ;;  %v960_v2 = vpop.eup %959 }
 0x13a   :  { %v1359_v48 = vadd.f32 1.0, %v960_v2  ;;  %v962_v4 = vpop.eup %961 }
 0x13b   :  { %963 = vpow2.f32 %v875_v57  ;;  %v612_v8 = vmul.f32 %v962_v4, %v603_v61  ;;  %vm617_vm1 = vweird.f32 %v962_v4 }
 0x13c   :  { %v355_v11 = vpop.f32.mrf.mxu3  ;;  %965 = vrcp.f32 %v1359_v48  ;;  %vm1382_vm2 = vmor %vm616_vm0, %vm617_vm1  ;;  %vm631_vm4 = vweird.f32 %v1359_v48  ;;  %v637_v37 = vand.u32 2147483648, %v1359_v48  ;;  %v635_v51 = vand.u32 2147483647, %v1359_v48 }
 0x13d   :  { %v356_v63 = vadd.f32 %v355_v11, %v1353_v45  ;;  %v613_v10 = vsub.f32 1.0, %v612_v8 }
 0x13e   :  { %v638_v58 = vor.u32 1.1754944e-38, %v637_v37  ;;  %vm636_vm7 = vcmp.eq.f32.partialorder %v635_v51, 8.507059e+37 }
 0x13f   :  { %v574_v15 = vadd.f32 %v356_v63, %v217_v55  ;;  %v614_v24 = vmul.f32 %v962_v4, %v613_v10 }
 0x141   :  { %v876_v7 = vmul.f32 -1.442695, %v574_v15  ;;  %v964_v12 = vpop.eup %963  ;;  %v615_v13 = vadd.f32 %v962_v4, %v614_v24  ;;  %v1005_v15 = vld [vmem:[#allocation2] sm:$0xff] }
 0x142   :  { %v1364_v9 = vadd.f32 1.0, %v964_v12  ;;  %v1366_v17 = vpop.eup %965 }
 0x143   :  { %967 = vpow2.f32 %v876_v7  ;;  %v627_v23 = vmul.f32 %v1366_v17, %v1359_v48  ;;  %v619_v38 = vsel %vm1382_vm2, %v962_v4, %v615_v13  ;;  %vm632_vm5 = vweird.f32 %v1366_v17  ;;  %v396_v4 = vpop.f32.mrf.mxu0  ;;  %v1006_v13 = vld [vmem:[#allocation2 + $0x8] sm:$0xff] }
 0x144   :  { %v358_v62 = vpop.f32.mrf.mxu3  ;;  %969 = vrcp.f32 %v1364_v9  ;;  %vm1404_vm6 = vmor %vm631_vm4, %vm632_vm5  ;;  %vm646_vm8 = vweird.f32 %v1364_v9  ;;  %v652_v7 = vand.u32 2147483648, %v1364_v9 }
 0x145   :  { %v359_v5 = vadd.f32 %v358_v62, %v1353_v45  ;;  %v628_v29 = vsub.f32 1.0, %v627_v23 }
 0x147   :  { %v575_v16 = vadd.f32 %v359_v5, %v1336_v6  ;;  %v1373_v6 = vperm.slane %v1311_v52, 2  ;;  %v629_v41 = vmul.f32 %v1366_v17, %v628_v29 }
 0x149   :  { %v877_v18 = vmul.f32 -1.442695, %v575_v16  ;;  %v968_v60 = vpop.eup %967  ;;  %v388_v30 = vadd.f32 %v387_v3, %v1373_v6  ;;  %v630_v49 = vadd.f32 %v1366_v17, %v629_v41  ;;  %v391_v54 = vadd.f32 %v390_v21, %v1373_v6 }
 0x14a   :  { %v1376_v28 = vadd.f32 1.0, %v968_v60  ;;  %v1378_v26 = vpop.eup %969  ;;  %v397_v41 = vadd.f32 %v396_v4, %v1373_v6 }
 0x14b   :  { %971 = vpow2.f32 %v877_v18  ;;  %v642_v36 = vmul.f32 %v1378_v26, %v1364_v9  ;;  %v634_v62 = vsel %vm1404_vm6, %v1366_v17, %v630_v49  ;;  %vm647_vm9 = vweird.f32 %v1378_v26 }
 0x14c   :  { %v361_v25 = vpop.f32.mrf.mxu3  ;;  %973 = vrcp.f32 %v1376_v28  ;;  %v394_v18 = vadd.f32 %v393_v42, %v1373_v6  ;;  %vm1426_vm10 = vmor %vm646_vm8, %vm647_vm9  ;;  %vm661_vm12 = vweird.f32 %v1376_v28 }
 0x14d   :  { %v362_v19 = vadd.f32 %v361_v25, %v1353_v45  ;;  %v643_v47 = vsub.f32 1.0, %v642_v36  ;;  %v639_v25 = vsel %vm636_vm7, %v638_v58, %v634_v62  ;;  %v665_v36 = vand.u32 2147483647, %v1376_v28 }
 0x14e   :  { %v805_v21 = vsub.f32 1.0, %v639_v25 }
 0x14f   :  { %v576_v27 = vadd.f32 %v362_v19, %v1342_v0  ;;  %v623_v0 = vor.u32 1.1754944e-38, %v622_v35  ;;  %v644_v63 = vmul.f32 %v1378_v26, %v643_v47  ;;  %vm666_vm15 = vcmp.eq.f32.partialorder %v665_v36, 8.507059e+37 }
 0x150   :  { %v813_v1 = vmul.f32 %v1006_v13, %v805_v21 }
 0x151   :  { %v878_v33 = vmul.f32 -1.442695, %v576_v27  ;;  %v972_v34 = vpop.eup %971  ;;  %v624_v14 = vsel %vm621_vm3, %v623_v0, %v619_v38  ;;  %v645_v16 = vadd.f32 %v1378_v26, %v644_v63  ;;  %v399_v38 = vpop.f32.mrf.mxu0 }
 0x152   :  { %v1395_v46 = vadd.f32 1.0, %v972_v34  ;;  %v1400_v11 = vpop.eup %973  ;;  %v804_v56 = vsub.f32 1.0, %v624_v14  ;;  %v400_v63 = vadd.f32 %v399_v38, %v1373_v6 }
 0x153   :  { %975 = vpow2.f32 %v878_v33  ;;  %v657_v61 = vmul.f32 %v1400_v11, %v1376_v28  ;;  %vm662_vm13 = vweird.f32 %v1400_v11 }
 0x154   :  { %v364_v22 = vpop.f32.mrf.mxu3  ;;  %v812_v48 = vmul.f32 %v1005_v15, %v804_v56  ;;  %vm1447_vm14 = vmor %vm661_vm12, %vm662_vm13  ;;  %vm676_vm0 = vweird.f32 %v1395_v46  ;;  %v682_v58 = vand.u32 2147483648, %v1395_v46  ;;  %v680_v62 = vand.u32 2147483647, %v1395_v46 }
 0x155   :  { %v365_v31 = vadd.f32 %v364_v22, %v1353_v45  ;;  %v658_v12 = vsub.f32 1.0, %v657_v61  ;;  %v653_v22 = vor.u32 1.1754944e-38, %v652_v7 }
 0x156   :  { %v683_v15 = vor.u32 1.1754944e-38, %v682_v58  ;;  %vm681_vm3 = vcmp.eq.f32.partialorder %v680_v62, 8.507059e+37 }
 0x157   :  { %v577_v43 = vadd.f32 %v365_v31, %v1345_v20  ;;  %v659_v27 = vmul.f32 %v1400_v11, %v658_v12  ;;  %v1008_v12 = vld [vmem:[#allocation2 + $0x18] sm:$0xff] }
 0x159   :  { %v879_v20 = vmul.f32 -1.442695, %v577_v43  ;;  %v976_v59 = vpop.eup %975  ;;  %v660_v34 = vadd.f32 %v1400_v11, %v659_v27 }
 0x15a   :  { %v1418_v5 = vadd.f32 1.0, %v976_v59 }
 0x15c   :  { %v367_v44 = vpop.f32.mrf.mxu3  ;;  %vm691_vm4 = vweird.f32 %v1418_v5  ;;  %v695_v21 = vand.u32 2147483647, %v1418_v5 }
 0x15d   :  { %v368_v53 = vadd.f32 %v367_v44, %v1353_v45 }
 0x15e   :  { %vm696_vm7 = vcmp.eq.f32.partialorder %v695_v21, 8.507059e+37 }
 0x15f   :  { %v578_v55 = vadd.f32 %v368_v53, %v1349_v32  ;;  %v650_v32 = vand.u32 2147483647, %v1364_v9  ;;  %v649_v9 = vsel %vm1426_vm10, %v1378_v26, %v645_v16  ;;  %v667_v26 = vand.u32 2147483648, %v1376_v28 }
 0x160   :  { %v664_v28 = vsel %vm1447_vm14, %v1400_v11, %v660_v34 }
 0x161   :  { %v880_v17 = vmul.f32 -1.442695, %v578_v55  ;;  %vm651_vm11 = vcmp.eq.f32.partialorder %v650_v32, 8.507059e+37  ;;  %v668_v44 = vor.u32 1.1754944e-38, %v667_v26 }
 0x162   :  { %v654_v52 = vsel %vm651_vm11, %v653_v22, %v649_v9 }
 0x163   :  { %v806_v43 = vsub.f32 1.0, %v654_v52  ;;  %v669_v56 = vsel %vm666_vm15, %v668_v44, %v664_v28 }
 0x164   :  { %v807_v55 = vsub.f32 1.0, %v669_v56 }
 0x17b   :  { %v772_v39 = vpop.f32.mrf.mxu1 }
 0x17c   :  { %v773_v40 = vadd.f32 %v772_v39, %v388_v30 }
 0x17e   :  { %977 = vtanh.f32 %v773_v40 }
 0x17f   :  { %979 = vrcp.f32 %v1395_v46 }
 0x180   :  { %981 = vpow2.f32 %v879_v20  ;;  %v1007_v20 = vld [vmem:[#allocation2 + $0x10] sm:$0xff] }
 0x181   :  { %v814_v53 = vmul.f32 %v1007_v20, %v806_v43 }
 0x183   :  { %v775_v45 = vpop.f32.mrf.mxu1 }
 0x184   :  { %v978_v57 = vpop.eup %977  ;;  %v776_v2 = vadd.f32 %v775_v45, %v391_v54 }
 0x185   :  { %v820_v3 = vmul.f32 %v978_v57, %v624_v14  ;;  %v1423_v10 = vpop.eup %979 }
 0x186   :  { %983 = vtanh.f32 %v776_v2  ;;  %v982_v60 = vpop.eup %981  ;;  %v672_v23 = vmul.f32 %v1423_v10, %v1395_v46  ;;  %vm677_vm1 = vweird.f32 %v1423_v10  ;;  %v402_v2 = vpop.f32.mrf.mxu0 }
 0x187   :  { %v828_v8 = vadd.f32 %v820_v3, %v812_v48  ;;  %985 = vrcp.f32 %v1418_v5  ;;  %v1439_v30 = vadd.f32 1.0, %v982_v60  ;;  %vm1468_vm2 = vmor %vm676_vm0, %vm677_vm1  ;;  %v403_v22 = vadd.f32 %v402_v2, %v1373_v6 }
 0x188   :  { %987 = vpow2.f32 %v880_v17  ;;  %v673_v33 = vsub.f32 1.0, %v672_v23  ;;  %v697_v17 = vand.u32 2147483648, %v1418_v5 }
 0x189   :  { %836 = vst [vmem:[#allocation11] sm:$0xff] %v828_v8  ;;  %v815_v8 = vmul.f32 %v1008_v12, %v807_v55  ;;  %vm706_vm8 = vweird.f32 %v1439_v30  ;;  %v712_v34 = vand.u32 2147483648, %v1439_v30 }
 0x18a   :  { %v674_v47 = vmul.f32 %v1423_v10, %v673_v33 }
 0x18b   :  { %v778_v24 = vpop.f32.mrf.mxu1  ;;  %v713_v44 = vor.u32 1.1754944e-38, %v712_v34 }
 0x18c   :  { %v984_v35 = vpop.eup %983  ;;  %v779_v29 = vadd.f32 %v778_v24, %v394_v18  ;;  %v675_v61 = vadd.f32 %v1423_v10, %v674_v47  ;;  %v698_v24 = vor.u32 1.1754944e-38, %v697_v17 }
 0x18d   :  { %v821_v31 = vmul.f32 %v984_v35, %v639_v25  ;;  %v1444_v39 = vpop.eup %985 }
 0x18e   :  { %989 = vtanh.f32 %v779_v29  ;;  %v988_v40 = vpop.eup %987  ;;  %v687_v14 = vmul.f32 %v1444_v39, %v1418_v5  ;;  %v679_v46 = vsel %vm1468_vm2, %v1423_v10, %v675_v61  ;;  %vm692_vm5 = vweird.f32 %v1444_v39  ;;  %v405_v29 = vpop.f32.mrf.mxu0 }
 0x18f   :  { %v829_v0 = vadd.f32 %v821_v31, %v813_v1  ;;  %991 = vrcp.f32 %v1439_v30  ;;  %v1460_v50 = vadd.f32 1.0, %v988_v40  ;;  %v684_v32 = vsel %vm681_vm3, %v683_v15, %v679_v46  ;;  %vm1487_vm6 = vmor %vm691_vm4, %vm692_vm5  ;;  %v1011_v15 = vld [vmem:[#allocation2 + $0x30] sm:$0xff] }
 0x190   :  { %v688_v11 = vsub.f32 1.0, %v687_v14  ;;  %v808_v9 = vsub.f32 1.0, %v684_v32  ;;  %v406_v42 = vadd.f32 %v405_v29, %v1373_v6 }
 0x191   :  { %837 = vst [vmem:[#allocation11 + $0x8] sm:$0xff] %v829_v0  ;;  %vm721_vm12 = vweird.f32 %v1460_v50 }
 0x192   :  { %v689_v4 = vmul.f32 %v1444_v39, %v688_v11 }
 0x193   :  { %v781_v37 = vpop.f32.mrf.mxu1 }
 0x194   :  { %v990_v49 = vpop.eup %989  ;;  %v782_v51 = vadd.f32 %v781_v37, %v397_v41  ;;  %v690_v10 = vadd.f32 %v1444_v39, %v689_v4  ;;  %v710_v41 = vand.u32 2147483647, %v1439_v30 }
 0x195   :  { %v822_v54 = vmul.f32 %v990_v49, %v654_v52  ;;  %v1465_v45 = vpop.eup %991  ;;  %v1009_v52 = vld [vmem:[#allocation2 + $0x20] sm:$0xff] }
 0x196   :  { %993 = vtanh.f32 %v782_v51  ;;  %v702_v48 = vmul.f32 %v1465_v45, %v1439_v30  ;;  %v694_v35 = vsel %vm1487_vm6, %v1444_v39, %v690_v10  ;;  %v816_v26 = vmul.f32 %v1009_v52, %v808_v9  ;;  %v1010_v30 = vld [vmem:[#allocation2 + $0x28] sm:$0xff] }
 0x197   :  { %v830_v59 = vadd.f32 %v822_v54, %v814_v53  ;;  %995 = vrcp.f32 %v1460_v50  ;;  %vm707_vm9 = vweird.f32 %v1465_v45  ;;  %v699_v0 = vsel %vm696_vm7, %v698_v24, %v694_v35  ;;  %v408_v53 = vpop.f32.mrf.mxu0 }
 0x198   :  { %v703_v18 = vsub.f32 1.0, %v702_v48  ;;  %vm1503_vm10 = vmor %vm706_vm8, %vm707_vm9  ;;  %v809_v40 = vsub.f32 1.0, %v699_v0  ;;  %vm711_vm11 = vcmp.eq.f32.partialorder %v710_v41, 8.507059e+37  ;;  %v409_v61 = vadd.f32 %v408_v53, %v1373_v6  ;;  %v1012_v6 = vld [vmem:[#allocation2 + $0x38] sm:$0xff] }
 0x199   :  { %838 = vst [vmem:[#allocation11 + $0x10] sm:$0xff] %v830_v59  ;;  %v725_v59 = vand.u32 2147483647, %v1460_v50 }
 0x19a   :  { %v704_v13 = vmul.f32 %v1465_v45, %v703_v18  ;;  %v817_v51 = vmul.f32 %v1010_v30, %v809_v40 }
 0x19b   :  { %v784_v3 = vpop.f32.mrf.mxu1  ;;  %vm726_vm15 = vcmp.eq.f32.partialorder %v725_v59, 8.507059e+37 }
 0x19c   :  { %v994_v25 = vpop.eup %993  ;;  %v785_v7 = vadd.f32 %v784_v3, %v400_v63  ;;  %v705_v39 = vadd.f32 %v1465_v45, %v704_v13 }
 0x19d   :  { %v823_v16 = vmul.f32 %v994_v25, %v669_v56  ;;  %v1484_v60 = vpop.eup %995  ;;  %v727_v56 = vand.u32 2147483648, %v1460_v50 }
 0x19e   :  { %997 = vtanh.f32 %v785_v7  ;;  %v717_v27 = vmul.f32 %v1484_v60, %v1460_v50  ;;  %v709_v14 = vsel %vm1503_vm10, %v1465_v45, %v705_v39  ;;  %vm722_vm13 = vweird.f32 %v1484_v60 }
 0x19f   :  { %v831_v19 = vadd.f32 %v823_v16, %v815_v8  ;;  %v714_v54 = vsel %vm711_vm11, %v713_v44, %v709_v14  ;;  %vm723_vm14 = vmor %vm721_vm12, %vm722_vm13  ;;  %v728_v45 = vor.u32 1.1754944e-38, %v727_v56 }
 0x1a0   :  { %v718_v36 = vsub.f32 1.0, %v717_v27  ;;  %v810_v62 = vsub.f32 1.0, %v714_v54 }
 0x1a1   :  { %839 = vst [vmem:[#allocation11 + $0x18] sm:$0xff] %v831_v19 }
 0x1a2   :  { %v719_v37 = vmul.f32 %v1484_v60, %v718_v36  ;;  %v818_v48 = vmul.f32 %v1011_v15, %v810_v62 }
 0x1a3   :  { %v787_v5 = vpop.f32.mrf.mxu1 }
 0x1a4   :  { %v998_v1 = vpop.eup %997  ;;  %v788_v31 = vadd.f32 %v787_v5, %v403_v22  ;;  %v720_v11 = vadd.f32 %v1484_v60, %v719_v37 }
 0x1a5   :  { %v824_v33 = vmul.f32 %v998_v1, %v684_v32 }
 0x1a6   :  { %999 = vtanh.f32 %v788_v31  ;;  %v724_v63 = vsel %vm723_vm14, %v1484_v60, %v720_v11 }
 0x1a7   :  { %v832_v38 = vadd.f32 %v824_v33, %v816_v26  ;;  %v729_v3 = vsel %vm726_vm15, %v728_v45, %v724_v63 }
 0x1a8   :  { %v811_v50 = vsub.f32 1.0, %v729_v3 }
 0x1a9   :  { %840 = vst [vmem:[#allocation11 + $0x20] sm:$0xff] %v832_v38 }
 0x1aa   :  { %v819_v7 = vmul.f32 %v1012_v6, %v811_v50 }
 0x1ab   :  { %v790_v28 = vpop.f32.mrf.mxu1 }
 0x1ac   :  { %v1000_v47 = vpop.eup %999  ;;  %v791_v49 = vadd.f32 %v790_v28, %v406_v42 }
 0x1ad   :  { %v825_v20 = vmul.f32 %v1000_v47, %v699_v0 }
 0x1ae   :  { %1001 = vtanh.f32 %v791_v49 }
 0x1af   :  { %v833_v58 = vadd.f32 %v825_v20, %v817_v51 }
 0x1b1   :  { %841 = vst [vmem:[#allocation11 + $0x28] sm:$0xff] %v833_v58 }
 0x1b3   :  { %v793_v57 = vpop.f32.mrf.mxu1 }
 0x1b4   :  { %v1002_v55 = vpop.eup %1001  ;;  %v794_v2 = vadd.f32 %v793_v57, %v409_v61 }
 0x1b5   :  { %v826_v46 = vmul.f32 %v1002_v55, %v714_v54 }
 0x1b6   :  { %1003 = vtanh.f32 %v794_v2 }
 0x1b7   :  { %v834_v4 = vadd.f32 %v826_v46, %v818_v48 }
 0x1b9   :  { %842 = vst [vmem:[#allocation11 + $0x30] sm:$0xff] %v834_v4 }
 0x1bc   :  { %v1004_v25 = vpop.eup %1003 }
 0x1bd   :  { %v827_v12 = vmul.f32 %v1004_v25, %v729_v3 }
 0x1bf   :  { %v835_v8 = vadd.f32 %v827_v12, %v819_v7 }
 0x1c1   :  { %843 = vst [vmem:[#allocation11 + $0x38] sm:$0xff] %v835_v8 }
 0x1c2   :  { %856 = dma.vmem_to_hbm [thread:$0]  %s849_s25, 1024, %s851_s28, [#allocation4], %s1166_s29, %s1166_s29, %s1167_s30  }
 0x1c3   :  { %1163 = dma.done.wait [#allocation4], 1024  }
 0x1c4   :  { %1164 = vsyncadd [#allocation4], 4294966272 }
 0x1c5   :  { %861 = vsyncpa [#allocation3], 1 }
 0x1c6   :  { %862 = vsyncpa [#allocation6], 1 }
 0x1c7   :  { %863 = vsyncpa [#allocation9], 1 }
 0x1c8   :  { %864 = vsyncpa [#allocation4], 1 }

</bundles_post_ra>
